<compile_context>
chip_gen: v7x
topology: tpu7x:2x2x1
jax: 0.10.0
libtpu: 0.0.40
codegen_flags: <defaults>
</compile_context>

<pallas_src>
import math

import jax
import jax.numpy as jnp
from jax.experimental import pallas as pl
from jax.experimental.pallas import tpu as pltpu


def _mha_kernel(xq_ref, xk_ref, xv_ref,
                wq_ref, wk_ref, wv_ref, wo_ref,
                bq_ref, bk_ref, bv_ref, bo_ref,
                o_ref,
                q_s, k_s, v_s):
    h = pl.program_id(1)
    H, S, d_k = q_s.shape
    cdt = wq_ref.dtype                       # MXU compute dtype (bf16)

    @pl.when(h == 0)
    def _init():
        # Wide Q/K/V projections, once per batch: (S, D) x (D, D) on the MXU
        # with full-D contraction.  Bias add in f32, cast to bf16 once, then
        # head-split into persistent VMEM scratch via static lane slices.
        def project(x_ref, w_ref, b_ref, dst):
            y = jnp.dot(x_ref[...].astype(cdt), w_ref[...],
                        preferred_element_type=jnp.float32) + b_ref[...]
            y = y.astype(cdt)
            for hh in range(H):              # H is static / small
                dst[hh] = y[:, hh * d_k:(hh + 1) * d_k]

        project(xq_ref, wq_ref, bq_ref, q_s)
        project(xk_ref, wk_ref, bk_ref, k_s)
        project(xv_ref, wv_ref, bv_ref, v_s)

        # Initialize the resident output accumulator with the output bias.
        o_ref[...] = jnp.broadcast_to(bo_ref[...], o_ref.shape).astype(o_ref.dtype)

    # ---- one head per grid step (bounded (S, S) score footprint) ----
    q_h = q_s[h]                             # (S, d_k) bf16
    k_h = k_s[h]                             # (S, d_k) bf16
    v_h = v_s[h]                             # (S, d_k) bf16

    # 1/sqrt(d_k) already folded into Wq / bq on the host.
    s = jnp.einsum('qd,kd->qk', q_h, k_h,
                   preferred_element_type=jnp.float32)         # (S, S) f32
    m = jnp.max(s, axis=-1, keepdims=True)
    e = jnp.exp(s - m)
    p = e / jnp.sum(e, axis=-1, keepdims=True)                  # exact softmax
    # TODO(synk): attention dropout (p=0.1) is identity in eval mode, and only
    # the mask=None path is implemented (masked / training-mode attention TBD).

    ctx = jnp.dot(p.astype(cdt), v_h,
                  preferred_element_type=jnp.float32)           # (S, d_k) f32

    # Head-h slice of the output projection, accumulated in f32 into the
    # resident output block (head concat folded into the sum over heads).
    o_ref[...] = o_ref[...] + jnp.dot(
        ctx.astype(cdt), wo_ref[...],
        preferred_element_type=jnp.float32).astype(o_ref.dtype)


def multi_headed_attention(query, key, value, params, *, num_heads,
                           mxu_dtype=jnp.bfloat16):
    """query/key/value: (B, S, D) float32. params: dict of Wq,bq,Wk,bk,Wv,bv,Wo,bo."""
    B, S, D = query.shape
    assert D % num_heads == 0
    d_k = D // num_heads
    scale = 1.0 / math.sqrt(d_k)

    # One-time host-side weight prep: transpose (nn.Linear stores (out, in)),
    # fold 1/sqrt(d_k) into the Q projection, head-split Wo, cast to bf16.
    wqT = (params["Wq"].T * scale).astype(mxu_dtype)            # (D, D)
    wkT = params["Wk"].T.astype(mxu_dtype)                      # (D, D)
    wvT = params["Wv"].T.astype(mxu_dtype)                      # (D, D)
    wo_h = params["Wo"].T.reshape(num_heads, d_k, D).astype(mxu_dtype)  # (H, d_k, D)

    bq = (params["bq"] * scale).reshape(1, D).astype(jnp.float32)
    bk = params["bk"].reshape(1, D).astype(jnp.float32)
    bv = params["bv"].reshape(1, D).astype(jnp.float32)
    bo = params["bo"].reshape(1, D).astype(jnp.float32)

    seq_spec = pl.BlockSpec((pl.Squeezed(), S, D), lambda b, h: (b, 0, 0))
    w_spec = pl.BlockSpec((D, D), lambda b, h: (0, 0))
    wo_spec = pl.BlockSpec((pl.Squeezed(), d_k, D), lambda b, h: (h, 0, 0))
    bias_spec = pl.BlockSpec((1, D), lambda b, h: (0, 0))
    out_spec = pl.BlockSpec((pl.Squeezed(), S, D), lambda b, h: (b, 0, 0))

    flops = B * (8 * S * D * D + 4 * S * S * D)
    bytes_accessed = (4 * B * S * D * query.dtype.itemsize          # q,k,v in + out
                      + 4 * D * D * jnp.dtype(mxu_dtype).itemsize   # weight mats
                      + 4 * D * 4)                                  # biases (f32)
    cost = pl.CostEstimate(flops=flops,
                           transcendentals=B * num_heads * S * S,
                           bytes_accessed=bytes_accessed)

    return pl.pallas_call(
        _mha_kernel,
        out_shape=jax.ShapeDtypeStruct((B, S, D), query.dtype),
        grid_spec=pltpu.PrefetchScalarGridSpec(
            num_scalar_prefetch=0,
            grid=(B, num_heads),
            in_specs=[seq_spec, seq_spec, seq_spec,
                      w_spec, w_spec, w_spec, wo_spec,
                      bias_spec, bias_spec, bias_spec, bias_spec],
            out_specs=out_spec,
            scratch_shapes=[pltpu.VMEM((num_heads, S, d_k), mxu_dtype),
                            pltpu.VMEM((num_heads, S, d_k), mxu_dtype),
                            pltpu.VMEM((num_heads, S, d_k), mxu_dtype)],
        ),
        compiler_params=pltpu.CompilerParams(
            dimension_semantics=("parallel", "arbitrary"),
            vmem_limit_bytes=48 * 1024 * 1024),
        cost_estimate=cost,
    )(query, key, value, wqT, wkT, wvT, wo_h, bq, bk, bv, bo)


def _reference(query, key, value, params, *, num_heads):
    """Pure-JAX f32 reference mirroring the PyTorch forward (mask=None, eval dropout)."""
    B, S, D = query.shape
    d_k = D // num_heads

    def lin(x, w, b):
        return x @ w.T + b

    q = lin(query, params["Wq"], params["bq"]).reshape(B, S, num_heads, d_k).transpose(0, 2, 1, 3)
    k = lin(key, params["Wk"], params["bk"]).reshape(B, S, num_heads, d_k).transpose(0, 2, 1, 3)
    v = lin(value, params["Wv"], params["bv"]).reshape(B, S, num_heads, d_k).transpose(0, 2, 1, 3)

    scores = jnp.einsum("bhqd,bhkd->bhqk", q, k) / math.sqrt(d_k)
    p = jax.nn.softmax(scores, axis=-1)
    ctx = jnp.einsum("bhqk,bhkd->bhqd", p, v)
    ctx = ctx.transpose(0, 2, 1, 3).reshape(B, S, D)
    return lin(ctx, params["Wo"], params["bo"])


if __name__ == "__main__":
    B, S, D, H = 2, 8, 32, 4  # batch, seq, d_model, heads

    key0 = jax.random.PRNGKey(0)
    ks = jax.random.split(key0, 11)

    # Deterministic synthetic parameters (stand-ins for user_eigen / item_eigen /
    # item_latent_sim checkpoints and the output linear — no file loading).
    params = {
        "Wq": jax.random.normal(ks[0], (D, D), jnp.float32) * 0.05,
        "bq": jax.random.normal(ks[1], (D,), jnp.float32) * 0.05,
        "Wk": jax.random.normal(ks[2], (D, D), jnp.float32) * 0.05,
        "bk": jax.random.normal(ks[3], (D,), jnp.float32) * 0.05,
        "Wv": jax.random.normal(ks[4], (D, D), jnp.float32) * 0.05,
        "bv": jax.random.normal(ks[5], (D,), jnp.float32) * 0.05,
        "Wo": jax.random.normal(ks[6], (D, D), jnp.float32) * 0.05,
        "bo": jax.random.normal(ks[7], (D,), jnp.float32) * 0.05,
    }

    query = jax.random.normal(ks[8], (B, S, D), jnp.float32)
    key_in = jax.random.normal(ks[9], (B, S, D), jnp.float32)
    value = jax.random.normal(ks[10], (B, S, D), jnp.float32)

    out = multi_headed_attention(query, key_in, value, params, num_heads=H)
    out = jax.block_until_ready(out)

    ref = _reference(query, key_in, value, params, num_heads=H)
    assert out.shape == (B, S, D)
    # bf16 MXU operands (exact f32 softmax) -> small, bounded mismatch vs f32 ref.
    assert jnp.allclose(out, ref, atol=2e-2, rtol=2e-2), \
        f"max abs err {float(jnp.max(jnp.abs(out - ref)))}"

    print("KERNEL_OK")
</pallas_src>

<mosaic_0001>
module attributes {stable_mosaic.version = 11 : i64} {
  func.func @_mha_kernel(%arg0: i32, %arg1: i32, %arg2: memref<1x8x32xf32, #tpu.memory_space<vmem>>, %arg3: memref<1x8x32xf32, #tpu.memory_space<vmem>>, %arg4: memref<1x8x32xf32, #tpu.memory_space<vmem>>, %arg5: memref<32x32xbf16, #tpu.memory_space<vmem>>, %arg6: memref<32x32xbf16, #tpu.memory_space<vmem>>, %arg7: memref<32x32xbf16, #tpu.memory_space<vmem>>, %arg8: memref<1x8x32xbf16, #tpu.memory_space<vmem>>, %arg9: memref<1x32xf32, #tpu.memory_space<vmem>>, %arg10: memref<1x32xf32, #tpu.memory_space<vmem>>, %arg11: memref<1x32xf32, #tpu.memory_space<vmem>>, %arg12: memref<1x32xf32, #tpu.memory_space<vmem>>, %arg13: memref<1x8x32xf32, #tpu.memory_space<vmem>>, %arg14: memref<4x8x8xbf16, #tpu.memory_space<vmem>>, %arg15: memref<4x8x8xbf16, #tpu.memory_space<vmem>>, %arg16: memref<4x8x8xbf16, #tpu.memory_space<vmem>>) attributes {dimension_semantics = [#tpu.dimension_semantics<parallel>, #tpu.dimension_semantics<arbitrary>], iteration_bounds = array<i64: 2, 4>, scalar_prefetch = 0 : i64, scratch_operands = 3 : i64, tpu.core_type = #tpu.core_type<tc>, window_params = [{transform_indices = @transform_0, window_bounds = array<i64: 1, 8, 32>}, {transform_indices = @transform_1, window_bounds = array<i64: 1, 8, 32>}, {transform_indices = @transform_2, window_bounds = array<i64: 1, 8, 32>}, {pipeline_mode = #tpu.pipeline_mode<synchronous>, transform_indices = @transform_3, window_bounds = array<i64: 32, 32>}, {pipeline_mode = #tpu.pipeline_mode<synchronous>, transform_indices = @transform_4, window_bounds = array<i64: 32, 32>}, {pipeline_mode = #tpu.pipeline_mode<synchronous>, transform_indices = @transform_5, window_bounds = array<i64: 32, 32>}, {transform_indices = @transform_6, window_bounds = array<i64: 1, 8, 32>}, {pipeline_mode = #tpu.pipeline_mode<synchronous>, transform_indices = @transform_7, window_bounds = array<i64: 1, 32>}, {pipeline_mode = #tpu.pipeline_mode<synchronous>, transform_indices = @transform_8, window_bounds = array<i64: 1, 32>}, {pipeline_mode = #tpu.pipeline_mode<synchronous>, transform_indices = @transform_9, window_bounds = array<i64: 1, 32>}, {pipeline_mode = #tpu.pipeline_mode<synchronous>, transform_indices = @transform_10, window_bounds = array<i64: 1, 32>}, {transform_indices = @transform_11, window_bounds = array<i64: 1, 8, 32>}]} {
    %c0_i32 = arith.constant 0 : i32
    %0 = arith.cmpi eq, %arg1, %c0_i32 : i32
    %1 = arith.extui %0 : i1 to i32
    %c0_i32_0 = arith.constant 0 : i32
    %2 = arith.cmpi ne, %1, %c0_i32_0 : i32
    scf.if %2 {
      %c0_19 = arith.constant 0 : index
      %c0_20 = arith.constant 0 : index
      %c0_21 = arith.constant 0 : index
      %34 = vector.load %arg2[%c0_19, %c0_20, %c0_21] : memref<1x8x32xf32, #tpu.memory_space<vmem>>, vector<1x8x32xf32>
      %35 = vector.shape_cast %34 : vector<1x8x32xf32> to vector<8x32xf32>
      %36 = arith.truncf %35 : vector<8x32xf32> to vector<8x32xbf16>
      %c0_22 = arith.constant 0 : index
      %c0_23 = arith.constant 0 : index
      %37 = vector.load %arg5[%c0_22, %c0_23] : memref<32x32xbf16, #tpu.memory_space<vmem>>, vector<32x32xbf16>
      %cst_24 = arith.constant dense<0.000000e+00> : vector<8x32xf32>
      %38 = tpu.matmul %36, %37, %cst_24 {dimension_numbers = #tpu.dot_dimension_numbers<[1], [0], [0], [1], [0, 0, 1, 1], [], []>} : vector<8x32xbf16>, vector<32x32xbf16>, vector<8x32xf32> -> vector<8x32xf32>
      %c0_25 = arith.constant 0 : index
      %c0_26 = arith.constant 0 : index
      %39 = vector.load %arg9[%c0_25, %c0_26] : memref<1x32xf32, #tpu.memory_space<vmem>>, vector<1x32xf32>
      %40 = vector.broadcast %39 : vector<1x32xf32> to vector<8x32xf32>
      %41 = arith.addf %38, %40 : vector<8x32xf32>
      %42 = arith.truncf %41 : vector<8x32xf32> to vector<8x32xbf16>
      %43 = vector.extract_strided_slice %42 {offsets = [0, 0], sizes = [8, 8], strides = [1, 1]} : vector<8x32xbf16> to vector<8x8xbf16>
      %c0_27 = arith.constant 0 : index
      %c0_28 = arith.constant 0 : index
      %c0_29 = arith.constant 0 : index
      %44 = vector.load %arg14[%c0_27, %c0_28, %c0_29] : memref<4x8x8xbf16, #tpu.memory_space<vmem>>, vector<1x8x8xbf16>
      %45 = vector.shape_cast %44 : vector<1x8x8xbf16> to vector<8x8xbf16>
      %46 = vector.shape_cast %43 : vector<8x8xbf16> to vector<1x8x8xbf16>
      tpu.vector_store %arg14[%c0_27, %c0_28, %c0_29], %46 {strides = array<i32>} : memref<4x8x8xbf16, #tpu.memory_space<vmem>>, vector<1x8x8xbf16>,
      %47 = vector.extract_strided_slice %42 {offsets = [0, 8], sizes = [8, 8], strides = [1, 1]} : vector<8x32xbf16> to vector<8x8xbf16>
      %c1 = arith.constant 1 : index
      %c0_30 = arith.constant 0 : index
      %c0_31 = arith.constant 0 : index
      %48 = vector.load %arg14[%c1, %c0_30, %c0_31] : memref<4x8x8xbf16, #tpu.memory_space<vmem>>, vector<1x8x8xbf16>
      %49 = vector.shape_cast %48 : vector<1x8x8xbf16> to vector<8x8xbf16>
      %50 = vector.shape_cast %47 : vector<8x8xbf16> to vector<1x8x8xbf16>
      tpu.vector_store %arg14[%c1, %c0_30, %c0_31], %50 {strides = array<i32>} : memref<4x8x8xbf16, #tpu.memory_space<vmem>>, vector<1x8x8xbf16>,
      %51 = vector.extract_strided_slice %42 {offsets = [0, 16], sizes = [8, 8], strides = [1, 1]} : vector<8x32xbf16> to vector<8x8xbf16>
      %c2 = arith.constant 2 : index
      %c0_32 = arith.constant 0 : index
      %c0_33 = arith.constant 0 : index
      %52 = vector.load %arg14[%c2, %c0_32, %c0_33] : memref<4x8x8xbf16, #tpu.memory_space<vmem>>, vector<1x8x8xbf16>
      %53 = vector.shape_cast %52 : vector<1x8x8xbf16> to vector<8x8xbf16>
      %54 = vector.shape_cast %51 : vector<8x8xbf16> to vector<1x8x8xbf16>
      tpu.vector_store %arg14[%c2, %c0_32, %c0_33], %54 {strides = array<i32>} : memref<4x8x8xbf16, #tpu.memory_space<vmem>>, vector<1x8x8xbf16>,
      %55 = vector.extract_strided_slice %42 {offsets = [0, 24], sizes = [8, 8], strides = [1, 1]} : vector<8x32xbf16> to vector<8x8xbf16>
      %c3 = arith.constant 3 : index
      %c0_34 = arith.constant 0 : index
      %c0_35 = arith.constant 0 : index
      %56 = vector.load %arg14[%c3, %c0_34, %c0_35] : memref<4x8x8xbf16, #tpu.memory_space<vmem>>, vector<1x8x8xbf16>
      %57 = vector.shape_cast %56 : vector<1x8x8xbf16> to vector<8x8xbf16>
      %58 = vector.shape_cast %55 : vector<8x8xbf16> to vector<1x8x8xbf16>
      tpu.vector_store %arg14[%c3, %c0_34, %c0_35], %58 {strides = array<i32>} : memref<4x8x8xbf16, #tpu.memory_space<vmem>>, vector<1x8x8xbf16>,
      %c0_36 = arith.constant 0 : index
      %c0_37 = arith.constant 0 : index
      %c0_38 = arith.constant 0 : index
      %59 = vector.load %arg3[%c0_36, %c0_37, %c0_38] : memref<1x8x32xf32, #tpu.memory_space<vmem>>, vector<1x8x32xf32>
      %60 = vector.shape_cast %59 : vector<1x8x32xf32> to vector<8x32xf32>
      %61 = arith.truncf %60 : vector<8x32xf32> to vector<8x32xbf16>
      %c0_39 = arith.constant 0 : index
      %c0_40 = arith.constant 0 : index
      %62 = vector.load %arg6[%c0_39, %c0_40] : memref<32x32xbf16, #tpu.memory_space<vmem>>, vector<32x32xbf16>
      %cst_41 = arith.constant dense<0.000000e+00> : vector<8x32xf32>
      %63 = tpu.matmul %61, %62, %cst_41 {dimension_numbers = #tpu.dot_dimension_numbers<[1], [0], [0], [1], [0, 0, 1, 1], [], []>} : vector<8x32xbf16>, vector<32x32xbf16>, vector<8x32xf32> -> vector<8x32xf32>
      %c0_42 = arith.constant 0 : index
      %c0_43 = arith.constant 0 : index
      %64 = vector.load %arg10[%c0_42, %c0_43] : memref<1x32xf32, #tpu.memory_space<vmem>>, vector<1x32xf32>
      %65 = vector.broadcast %64 : vector<1x32xf32> to vector<8x32xf32>
      %66 = arith.addf %63, %65 : vector<8x32xf32>
      %67 = arith.truncf %66 : vector<8x32xf32> to vector<8x32xbf16>
      %68 = vector.extract_strided_slice %67 {offsets = [0, 0], sizes = [8, 8], strides = [1, 1]} : vector<8x32xbf16> to vector<8x8xbf16>
      %c0_44 = arith.constant 0 : index
      %c0_45 = arith.constant 0 : index
      %c0_46 = arith.constant 0 : index
      %69 = vector.load %arg15[%c0_44, %c0_45, %c0_46] : memref<4x8x8xbf16, #tpu.memory_space<vmem>>, vector<1x8x8xbf16>
      %70 = vector.shape_cast %69 : vector<1x8x8xbf16> to vector<8x8xbf16>
      %71 = vector.shape_cast %68 : vector<8x8xbf16> to vector<1x8x8xbf16>
      tpu.vector_store %arg15[%c0_44, %c0_45, %c0_46], %71 {strides = array<i32>} : memref<4x8x8xbf16, #tpu.memory_space<vmem>>, vector<1x8x8xbf16>,
      %72 = vector.extract_strided_slice %67 {offsets = [0, 8], sizes = [8, 8], strides = [1, 1]} : vector<8x32xbf16> to vector<8x8xbf16>
      %c1_47 = arith.constant 1 : index
      %c0_48 = arith.constant 0 : index
      %c0_49 = arith.constant 0 : index
      %73 = vector.load %arg15[%c1_47, %c0_48, %c0_49] : memref<4x8x8xbf16, #tpu.memory_space<vmem>>, vector<1x8x8xbf16>
      %74 = vector.shape_cast %73 : vector<1x8x8xbf16> to vector<8x8xbf16>
      %75 = vector.shape_cast %72 : vector<8x8xbf16> to vector<1x8x8xbf16>
      tpu.vector_store %arg15[%c1_47, %c0_48, %c0_49], %75 {strides = array<i32>} : memref<4x8x8xbf16, #tpu.memory_space<vmem>>, vector<1x8x8xbf16>,
      %76 = vector.extract_strided_slice %67 {offsets = [0, 16], sizes = [8, 8], strides = [1, 1]} : vector<8x32xbf16> to vector<8x8xbf16>
      %c2_50 = arith.constant 2 : index
      %c0_51 = arith.constant 0 : index
      %c0_52 = arith.constant 0 : index
      %77 = vector.load %arg15[%c2_50, %c0_51, %c0_52] : memref<4x8x8xbf16, #tpu.memory_space<vmem>>, vector<1x8x8xbf16>
      %78 = vector.shape_cast %77 : vector<1x8x8xbf16> to vector<8x8xbf16>
      %79 = vector.shape_cast %76 : vector<8x8xbf16> to vector<1x8x8xbf16>
      tpu.vector_store %arg15[%c2_50, %c0_51, %c0_52], %79 {strides = array<i32>} : memref<4x8x8xbf16, #tpu.memory_space<vmem>>, vector<1x8x8xbf16>,
      %80 = vector.extract_strided_slice %67 {offsets = [0, 24], sizes = [8, 8], strides = [1, 1]} : vector<8x32xbf16> to vector<8x8xbf16>
      %c3_53 = arith.constant 3 : index
      %c0_54 = arith.constant 0 : index
      %c0_55 = arith.constant 0 : index
      %81 = vector.load %arg15[%c3_53, %c0_54, %c0_55] : memref<4x8x8xbf16, #tpu.memory_space<vmem>>, vector<1x8x8xbf16>
      %82 = vector.shape_cast %81 : vector<1x8x8xbf16> to vector<8x8xbf16>
      %83 = vector.shape_cast %80 : vector<8x8xbf16> to vector<1x8x8xbf16>
      tpu.vector_store %arg15[%c3_53, %c0_54, %c0_55], %83 {strides = array<i32>} : memref<4x8x8xbf16, #tpu.memory_space<vmem>>, vector<1x8x8xbf16>,
      %c0_56 = arith.constant 0 : index
      %c0_57 = arith.constant 0 : index
      %c0_58 = arith.constant 0 : index
      %84 = vector.load %arg4[%c0_56, %c0_57, %c0_58] : memref<1x8x32xf32, #tpu.memory_space<vmem>>, vector<1x8x32xf32>
      %85 = vector.shape_cast %84 : vector<1x8x32xf32> to vector<8x32xf32>
      %86 = arith.truncf %85 : vector<8x32xf32> to vector<8x32xbf16>
      %c0_59 = arith.constant 0 : index
      %c0_60 = arith.constant 0 : index
      %87 = vector.load %arg7[%c0_59, %c0_60] : memref<32x32xbf16, #tpu.memory_space<vmem>>, vector<32x32xbf16>
      %cst_61 = arith.constant dense<0.000000e+00> : vector<8x32xf32>
      %88 = tpu.matmul %86, %87, %cst_61 {dimension_numbers = #tpu.dot_dimension_numbers<[1], [0], [0], [1], [0, 0, 1, 1], [], []>} : vector<8x32xbf16>, vector<32x32xbf16>, vector<8x32xf32> -> vector<8x32xf32>
      %c0_62 = arith.constant 0 : index
      %c0_63 = arith.constant 0 : index
      %89 = vector.load %arg11[%c0_62, %c0_63] : memref<1x32xf32, #tpu.memory_space<vmem>>, vector<1x32xf32>
      %90 = vector.broadcast %89 : vector<1x32xf32> to vector<8x32xf32>
      %91 = arith.addf %88, %90 : vector<8x32xf32>
      %92 = arith.truncf %91 : vector<8x32xf32> to vector<8x32xbf16>
      %93 = vector.extract_strided_slice %92 {offsets = [0, 0], sizes = [8, 8], strides = [1, 1]} : vector<8x32xbf16> to vector<8x8xbf16>
      %c0_64 = arith.constant 0 : index
      %c0_65 = arith.constant 0 : index
      %c0_66 = arith.constant 0 : index
      %94 = vector.load %arg16[%c0_64, %c0_65, %c0_66] : memref<4x8x8xbf16, #tpu.memory_space<vmem>>, vector<1x8x8xbf16>
      %95 = vector.shape_cast %94 : vector<1x8x8xbf16> to vector<8x8xbf16>
      %96 = vector.shape_cast %93 : vector<8x8xbf16> to vector<1x8x8xbf16>
      tpu.vector_store %arg16[%c0_64, %c0_65, %c0_66], %96 {strides = array<i32>} : memref<4x8x8xbf16, #tpu.memory_space<vmem>>, vector<1x8x8xbf16>,
      %97 = vector.extract_strided_slice %92 {offsets = [0, 8], sizes = [8, 8], strides = [1, 1]} : vector<8x32xbf16> to vector<8x8xbf16>
      %c1_67 = arith.constant 1 : index
      %c0_68 = arith.constant 0 : index
      %c0_69 = arith.constant 0 : index
      %98 = vector.load %arg16[%c1_67, %c0_68, %c0_69] : memref<4x8x8xbf16, #tpu.memory_space<vmem>>, vector<1x8x8xbf16>
      %99 = vector.shape_cast %98 : vector<1x8x8xbf16> to vector<8x8xbf16>
      %100 = vector.shape_cast %97 : vector<8x8xbf16> to vector<1x8x8xbf16>
      tpu.vector_store %arg16[%c1_67, %c0_68, %c0_69], %100 {strides = array<i32>} : memref<4x8x8xbf16, #tpu.memory_space<vmem>>, vector<1x8x8xbf16>,
      %101 = vector.extract_strided_slice %92 {offsets = [0, 16], sizes = [8, 8], strides = [1, 1]} : vector<8x32xbf16> to vector<8x8xbf16>
      %c2_70 = arith.constant 2 : index
      %c0_71 = arith.constant 0 : index
      %c0_72 = arith.constant 0 : index
      %102 = vector.load %arg16[%c2_70, %c0_71, %c0_72] : memref<4x8x8xbf16, #tpu.memory_space<vmem>>, vector<1x8x8xbf16>
      %103 = vector.shape_cast %102 : vector<1x8x8xbf16> to vector<8x8xbf16>
      %104 = vector.shape_cast %101 : vector<8x8xbf16> to vector<1x8x8xbf16>
      tpu.vector_store %arg16[%c2_70, %c0_71, %c0_72], %104 {strides = array<i32>} : memref<4x8x8xbf16, #tpu.memory_space<vmem>>, vector<1x8x8xbf16>,
      %105 = vector.extract_strided_slice %92 {offsets = [0, 24], sizes = [8, 8], strides = [1, 1]} : vector<8x32xbf16> to vector<8x8xbf16>
      %c3_73 = arith.constant 3 : index
      %c0_74 = arith.constant 0 : index
      %c0_75 = arith.constant 0 : index
      %106 = vector.load %arg16[%c3_73, %c0_74, %c0_75] : memref<4x8x8xbf16, #tpu.memory_space<vmem>>, vector<1x8x8xbf16>
      %107 = vector.shape_cast %106 : vector<1x8x8xbf16> to vector<8x8xbf16>
      %108 = vector.shape_cast %105 : vector<8x8xbf16> to vector<1x8x8xbf16>
      tpu.vector_store %arg16[%c3_73, %c0_74, %c0_75], %108 {strides = array<i32>} : memref<4x8x8xbf16, #tpu.memory_space<vmem>>, vector<1x8x8xbf16>,
      %c0_76 = arith.constant 0 : index
      %c0_77 = arith.constant 0 : index
      %109 = vector.load %arg12[%c0_76, %c0_77] : memref<1x32xf32, #tpu.memory_space<vmem>>, vector<1x32xf32>
      %110 = vector.shape_cast %109 : vector<1x32xf32> to vector<1x32xf32>
      %111 = vector.broadcast %110 : vector<1x32xf32> to vector<8x32xf32>
      %c0_78 = arith.constant 0 : index
      %c0_79 = arith.constant 0 : index
      %c0_80 = arith.constant 0 : index
      %112 = vector.load %arg13[%c0_78, %c0_79, %c0_80] : memref<1x8x32xf32, #tpu.memory_space<vmem>>, vector<1x8x32xf32>
      %113 = vector.shape_cast %112 : vector<1x8x32xf32> to vector<8x32xf32>
      %114 = vector.shape_cast %111 : vector<8x32xf32> to vector<1x8x32xf32>
      tpu.vector_store %arg13[%c0_78, %c0_79, %c0_80], %114 {strides = array<i32>} : memref<1x8x32xf32, #tpu.memory_space<vmem>>, vector<1x8x32xf32>,
    } else {
    }
    %3 = arith.index_cast %arg1 : i32 to index
    %c0 = arith.constant 0 : index
    %c0_1 = arith.constant 0 : index
    %4 = vector.load %arg14[%3, %c0, %c0_1] : memref<4x8x8xbf16, #tpu.memory_space<vmem>>, vector<1x8x8xbf16>
    %5 = vector.shape_cast %4 : vector<1x8x8xbf16> to vector<8x8xbf16>
    %6 = arith.index_cast %arg1 : i32 to index
    %c0_2 = arith.constant 0 : index
    %c0_3 = arith.constant 0 : index
    %7 = vector.load %arg15[%6, %c0_2, %c0_3] : memref<4x8x8xbf16, #tpu.memory_space<vmem>>, vector<1x8x8xbf16>
    %8 = vector.shape_cast %7 : vector<1x8x8xbf16> to vector<8x8xbf16>
    %9 = arith.index_cast %arg1 : i32 to index
    %c0_4 = arith.constant 0 : index
    %c0_5 = arith.constant 0 : index
    %10 = vector.load %arg16[%9, %c0_4, %c0_5] : memref<4x8x8xbf16, #tpu.memory_space<vmem>>, vector<1x8x8xbf16>
    %11 = vector.shape_cast %10 : vector<1x8x8xbf16> to vector<8x8xbf16>
    "tpu.trace_start"() <{level = 10 : i32, message = "qd,kd->qk"}> : () -> ()
    %cst = arith.constant dense<0.000000e+00> : vector<8x8xf32>
    %12 = tpu.matmul %5, %8, %cst {dimension_numbers = #tpu.dot_dimension_numbers<[1], [1], [0], [0], [0, 0, 1, 0], [], []>} : vector<8x8xbf16>, vector<8x8xbf16>, vector<8x8xf32> -> vector<8x8xf32>
    "tpu.trace_stop"() : () -> ()
    %cst_6 = arith.constant dense<0xFF800000> : vector<8xf32>
    %13 = vector.multi_reduction <maximumf>, %12, %cst_6 [1] : vector<8x8xf32> to vector<8xf32>
    %14 = vector.shape_cast %13 : vector<8xf32> to vector<8x1xf32>
    %15 = vector.broadcast %14 : vector<8x1xf32> to vector<8x8xf32>
    %16 = arith.subf %12, %15 : vector<8x8xf32>
    %17 = math.exp %16 : vector<8x8xf32>
    %cst_7 = arith.constant dense<0.000000e+00> : vector<8xf32>
    %18 = vector.multi_reduction <add>, %17, %cst_7 [1] : vector<8x8xf32> to vector<8xf32>
    %19 = vector.shape_cast %18 : vector<8xf32> to vector<8x1xf32>
    %20 = vector.broadcast %19 : vector<8x1xf32> to vector<8x8xf32>
    %21 = arith.divf %17, %20 : vector<8x8xf32>
    %22 = arith.truncf %21 : vector<8x8xf32> to vector<8x8xbf16>
    %cst_8 = arith.constant dense<0.000000e+00> : vector<8x8xf32>
    %23 = tpu.matmul %22, %11, %cst_8 {dimension_numbers = #tpu.dot_dimension_numbers<[1], [0], [0], [1], [0, 0, 1, 1], [], []>} : vector<8x8xbf16>, vector<8x8xbf16>, vector<8x8xf32> -> vector<8x8xf32>
    %c0_9 = arith.constant 0 : index
    %c0_10 = arith.constant 0 : index
    %c0_11 = arith.constant 0 : index
    %24 = vector.load %arg13[%c0_9, %c0_10, %c0_11] : memref<1x8x32xf32, #tpu.memory_space<vmem>>, vector<1x8x32xf32>
    %25 = vector.shape_cast %24 : vector<1x8x32xf32> to vector<8x32xf32>
    %26 = arith.truncf %23 : vector<8x8xf32> to vector<8x8xbf16>
    %c0_12 = arith.constant 0 : index
    %c0_13 = arith.constant 0 : index
    %c0_14 = arith.constant 0 : index
    %27 = vector.load %arg8[%c0_12, %c0_13, %c0_14] : memref<1x8x32xbf16, #tpu.memory_space<vmem>>, vector<1x8x32xbf16>
    %28 = vector.shape_cast %27 : vector<1x8x32xbf16> to vector<8x32xbf16>
    %cst_15 = arith.constant dense<0.000000e+00> : vector<8x32xf32>
    %29 = tpu.matmul %26, %28, %cst_15 {dimension_numbers = #tpu.dot_dimension_numbers<[1], [0], [0], [1], [0, 0, 1, 1], [], []>} : vector<8x8xbf16>, vector<8x32xbf16>, vector<8x32xf32> -> vector<8x32xf32>
    %30 = arith.addf %25, %29 : vector<8x32xf32>
    %c0_16 = arith.constant 0 : index
    %c0_17 = arith.constant 0 : index
    %c0_18 = arith.constant 0 : index
    %31 = vector.load %arg13[%c0_16, %c0_17, %c0_18] : memref<1x8x32xf32, #tpu.memory_space<vmem>>, vector<1x8x32xf32>
    %32 = vector.shape_cast %31 : vector<1x8x32xf32> to vector<8x32xf32>
    %33 = vector.shape_cast %30 : vector<8x32xf32> to vector<1x8x32xf32>
    tpu.vector_store %arg13[%c0_16, %c0_17, %c0_18], %33 {strides = array<i32>} : memref<1x8x32xf32, #tpu.memory_space<vmem>>, vector<1x8x32xf32>,
    return
  }
  func.func @transform_0(%arg0: i32, %arg1: i32) -> (i32, i32, i32) {
    %c0_i32 = arith.constant 0 : i32
    %c0_i32_0 = arith.constant 0 : i32
    %c0_i32_1 = arith.constant 0 : i32
    return %arg0, %c0_i32, %c0_i32_0 : i32, i32, i32
  }
  func.func @transform_1(%arg0: i32, %arg1: i32) -> (i32, i32, i32) {
    %c0_i32 = arith.constant 0 : i32
    %c0_i32_0 = arith.constant 0 : i32
    %c0_i32_1 = arith.constant 0 : i32
    return %arg0, %c0_i32, %c0_i32_0 : i32, i32, i32
  }
  func.func @transform_2(%arg0: i32, %arg1: i32) -> (i32, i32, i32) {
    %c0_i32 = arith.constant 0 : i32
    %c0_i32_0 = arith.constant 0 : i32
    %c0_i32_1 = arith.constant 0 : i32
    return %arg0, %c0_i32, %c0_i32_0 : i32, i32, i32
  }
  func.func @transform_3(%arg0: i32, %arg1: i32) -> (i32, i32) {
    %c0_i32 = arith.constant 0 : i32
    %c0_i32_0 = arith.constant 0 : i32
    %c0_i32_1 = arith.constant 0 : i32
    return %c0_i32, %c0_i32_0 : i32, i32
  }
  func.func @transform_4(%arg0: i32, %arg1: i32) -> (i32, i32) {
    %c0_i32 = arith.constant 0 : i32
    %c0_i32_0 = arith.constant 0 : i32
    %c0_i32_1 = arith.constant 0 : i32
    return %c0_i32, %c0_i32_0 : i32, i32
  }
  func.func @transform_5(%arg0: i32, %arg1: i32) -> (i32, i32) {
    %c0_i32 = arith.constant 0 : i32
    %c0_i32_0 = arith.constant 0 : i32
    %c0_i32_1 = arith.constant 0 : i32
    return %c0_i32, %c0_i32_0 : i32, i32
  }
  func.func @transform_6(%arg0: i32, %arg1: i32) -> (i32, i32, i32) {
    %c0_i32 = arith.constant 0 : i32
    %c0_i32_0 = arith.constant 0 : i32
    %c0_i32_1 = arith.constant 0 : i32
    return %arg1, %c0_i32, %c0_i32_0 : i32, i32, i32
  }
  func.func @transform_7(%arg0: i32, %arg1: i32) -> (i32, i32) {
    %c0_i32 = arith.constant 0 : i32
    %c0_i32_0 = arith.constant 0 : i32
    %c0_i32_1 = arith.constant 0 : i32
    return %c0_i32, %c0_i32_0 : i32, i32
  }
  func.func @transform_8(%arg0: i32, %arg1: i32) -> (i32, i32) {
    %c0_i32 = arith.constant 0 : i32
    %c0_i32_0 = arith.constant 0 : i32
    %c0_i32_1 = arith.constant 0 : i32
    return %c0_i32, %c0_i32_0 : i32, i32
  }
  func.func @transform_9(%arg0: i32, %arg1: i32) -> (i32, i32) {
    %c0_i32 = arith.constant 0 : i32
    %c0_i32_0 = arith.constant 0 : i32
    %c0_i32_1 = arith.constant 0 : i32
    return %c0_i32, %c0_i32_0 : i32, i32
  }
  func.func @transform_10(%arg0: i32, %arg1: i32) -> (i32, i32) {
    %c0_i32 = arith.constant 0 : i32
    %c0_i32_0 = arith.constant 0 : i32
    %c0_i32_1 = arith.constant 0 : i32
    return %c0_i32, %c0_i32_0 : i32, i32
  }
  func.func @transform_11(%arg0: i32, %arg1: i32) -> (i32, i32, i32) {
    %c0_i32 = arith.constant 0 : i32
    %c0_i32_0 = arith.constant 0 : i32
    %c0_i32_1 = arith.constant 0 : i32
    return %arg0, %c0_i32, %c0_i32_0 : i32, i32, i32
  }
}

</mosaic_0001>

<bundles_post_ra>
// kernel: tpu_custom_call.1
= control target key start
LH: loop header
LB: loop body
LE: loop exit
PB: predicated region body
PF: predicated region fallthrough
CT: control target
= control target key end

     0   :  { %s2334_s0 = inlined_call_operand.hbm [shape: f32[2,8,32], index: 0, kind: input, shape index: {}]   ;;  %s2335_s1 = inlined_call_operand.hbm [shape: f32[2,8,32], index: 1, kind: input, shape index: {}]   ;;  %s2336_s2 = inlined_call_operand.hbm [shape: f32[2,8,32], index: 2, kind: input, shape index: {}]   ;;  %s2337_s3 = inlined_call_operand.hbm [shape: bf16[32,32], index: 3, kind: input, shape index: {}]   ;;  %s2338_s4 = inlined_call_operand.hbm [shape: bf16[32,32], index: 4, kind: input, shape index: {}]   ;;  %s2339_s5 = inlined_call_operand.vmem [shape: bf16[32,32], index: 5, kind: input, shape index: {}]   ;;  %s2340_s6 = inlined_call_operand.hbm [shape: bf16[4,8,32], index: 6, kind: input, shape index: {}]   ;;  %s2341_s7 = inlined_call_operand.vmem [shape: f32[1,32], index: 7, kind: input, shape index: {}]   ;;  %s2342_s8 = inlined_call_operand.vmem [shape: f32[1,32], index: 8, kind: input, shape index: {}]   ;;  %s2343_s9 = inlined_call_operand.vmem [shape: f32[1,32], index: 9, kind: input, shape index: {}]   ;;  %s2344_s10 = inlined_call_operand.vmem [shape: f32[1,32], index: 10, kind: input, shape index: {}]   ;;  %s2345_s11 = inlined_call_operand.hbm [shape: f32[2,8,32], index: 11, kind: output, shape index: {}]  }
   0x1   :  { %2370 = sst [smem:[#allocation28_spill]] %s2335_s1 }
   0x2   :  { %2371 = sst [smem:[#allocation29_spill]] %s2337_s3 }
   0x3   :  { %2372 = sst [smem:[#allocation30_spill]] %s2339_s5 }
   0x4   :  { %2373 = sst [smem:[#allocation31_spill]] %s2341_s7 }
   0x5   :  { %2374 = sst [smem:[#allocation32_spill]] %s2342_s8 }
   0x6   :  { %2375 = sst [smem:[#allocation33_spill]] %s2343_s9 }
   0x7   :  { %2376 = sst [smem:[#allocation34_spill]] %s2344_s10 }
   0x8   :  { %2377 = sst [smem:[#allocation35_spill]] %s2345_s11 }
   0x9   :  { %16 = vsyncpa [#allocation6], 0 }
   0xa   :  { %18 = vsyncpa [#allocation6 + $0x1], 0 }
   0xb   :  { %19 = vsyncpa [#allocation9], 0 }
   0xc   :  { %21 = vsyncpa [#allocation9 + $0x1], 0 }
   0xd   :  { %22 = vsyncpa [#allocation12], 0 }
   0xe   :  { %23 = vsyncpa [#allocation15], 0 }
   0xf   :  { %25 = vsyncpa [#allocation15 + $0x1], 0 }
  0x10   :  { %26 = vsyncpa [#allocation7], 0 }
  0x11   :  { %28 = vsyncpa [#allocation7 + $0x1], 0  ;;  %s1837_s17 = smov 0   ;;  %s1839_s18 = smov 0  }
  0x12   :  { %s1841_s19 = smov 0   ;;  %s1843_s20 = smov 0  }
  0x13   :  { %s1845_s21 = smov 0   ;;  %s1847_s22 = smov 0  }
  0x14   :  { %s1849_s23 = smov 0   ;;  %s1851_s24 = smov 0  }
  0x15   :  { %s1853_s25 = smov 0   ;;  %s1855_s26 = smov 0  }
  0x16   :  { %s1857_s27 = smov 0  }
  0x17 LB: > { %2378 = sst [smem:[#allocation22_spill]] %s1731_s20  ;;  %s1893_s28 = sadd.s32 4294967295, %s1759_s27   ;;  %s1759_s27 = sphi %s1857_s27, %s34_s27   ;;  %s1755_s26 = sphi %s1855_s26, %s2441_s26   ;;  %s1751_s25 = sphi %s1853_s25, %s2440_s25   ;;  %s1747_s24 = sphi %s1851_s24, %s2439_s24   ;;  %s1743_s23 = sphi %s1849_s23, %s2438_s23   ;;  %s1739_s22 = sphi %s1847_s22, %s2437_s22   ;;  %s1735_s21 = sphi %s1845_s21, %s2436_s21   ;;  %s1731_s20 = sphi %s1843_s20, %s2435_s20   ;;  %s1727_s19 = sphi %s1841_s19, %s2434_s19   ;;  %s1723_s18 = sphi %s1839_s18, %s2433_s18   ;;  %s1719_s17 = sphi %s1837_s17, %s2432_s17  }
  0x18   : > { %2379 = sst [smem:[#allocation23_spill]] %s1743_s23  ;;  %p1185_p0 = scmp.ge.s32.totalorder %s1759_s27, 1 }
  0x19   : > { %2380 = sst [smem:[#allocation24_spill]] %s1747_s24  ;;  %p2347_p1 = scmp.eq.s32.totalorder %s1893_s28, 0 }
  0x1a   : > { %p328_p2 = scmp.lt.s32.totalorder %s1759_s27, 9  ;;  %s1761_s30 = smov [#allocation11]  }
  0x1b   : > { %s340_s12 = sshll.u32 %s1761_s30, 4  ;;  %s2383_s3 = sld [smem:[#allocation29_spill]]  ;;  %s341_s12 = int_to_ptr.vmem [resolvable:$true] %s340_s12 }
  0x1c   : > { %p1898_p3 = pnand %p1185_p0, %p328_p2 }
  0x1e   : > { %s2381_s29 = scalar_select %p1898_p3, 1, 0 }
  0x1f   : > { %p1310_p4 = pneg %p1898_p3 }
  0x21   : > { %p1906_p5 = pnand %p1310_p4, %p2347_p1  ;;  %s1449_s16 = scalar_lea.hbm %s2383_s3, 256 }
  0x22   : > { %p1450_p6 = scmp.ne.s32.totalorder %s2383_s3, %s1449_s16  ;;  %p1456_p10 = scmp.lt.u32.totalorder %s1449_s16, %s2383_s3 }
  0x23   : > { %s2382_s13 = scalar_select %p1906_p5, 1, 0 }
  0x24   : > { %p2359_p7 = pneg %p1906_p5 }
  0x26   : > { %p1452_p8 = pnand %p2359_p7, %p1450_p6 }
  0x28   : > { %p1453_p9 = pneg %p1452_p8 }
  0x2a   : > { %p1458_p11 = pnand %p1456_p10, %p1453_p9 }
  0x2c   : > { %1461 = shalt.err (!%p1458_p11)
}
  0x2d   : > { %s1462_s14 = scalar_lea.vmem %s341_s12, 256  ;;  %p1470_p2 = scmp.lt.s32.totalorder %s341_s12, %s341_s12 }
  0x2e   : > { %p1463_p12 = scmp.ne.s32.totalorder %s341_s12, %s1462_s14  ;;  %p1471_p4 = scmp.lt.s32.totalorder %s1462_s14, %s1462_s14 }
  0x30   : > { %p1465_p13 = pnand %p1463_p12, %p2359_p7  ;;  %p1472_p1 = por %p1471_p4, %p1470_p2 }
  0x32   : > { %p1466_p0 = pneg %p1465_p13 }
  0x34   : > { %p1473_p3 = pnand %p1472_p1, %p1466_p0 }
  0x36   : > { %1476 = shalt.err (!%p1473_p3)
}
  0x37   : > { %s2349_s11 = smov 64   ;;  %s2350_s9 = smov 4  }
  0x38   : > { %1313 = dma.hbm_to_vmem [thread:$0]  (!%p1906_p5), %s2383_s3, 256, %s341_s12, [#allocation12], %s2349_s11, %s2349_s11, %s2350_s9  }
  0x39   : > { %s1184_s16 = sadd.s32 4294967294, %s1759_s27   ;;  %p60_p1 = scmp.ne.s32.totalorder %s1739_s22, %s1735_s21 }
  0x3a   : > { %p2358_p3 = scmp.eq.s32.totalorder %s1759_s27, 0  ;;  %p66_p6 = scmp.ne.s32.totalorder %s1735_s21, %s1731_s20 }
  0x3b   : > { %p315_p8 = scmp.eq.s32.totalorder %s1893_s28, 7  ;;  %p321_p10 = scmp.eq.s32.totalorder %s1184_s16, 7 }
  0x3c   : > { %p62_p9 = por %p2358_p3, %p60_p1  ;;  %p2384_p11 = scmp.eq.s32.totalorder %s1893_s28, 0 }
  0x3d   : > { %p1952_p13 = por %p315_p8, %p60_p1  ;;  %p1956_p0 = por %p321_p10, %p66_p6 }
  0x3e   : > { %p1948_p12 = por %p2384_p11, %p66_p6  ;;  %p2357_p2 = scmp.lt.s32.totalorder %s1759_s27, 8 }
  0x3f   : > { %s2387_s12 = scalar_select %p1952_p13, 1, 0 }
  0x40   : > { %s2385_s8 = scalar_select %p1948_p12, 1, 0 }
  0x41   : > { %2388 = sst [smem:[#allocation26_spill]] %s2387_s12  ;;  %s2353_s15 = sand.u32 1, %s1739_s22  }
  0x42   : > { %2386 = sst [smem:[#allocation25_spill]] %s2385_s8  ;;  %s1963_s14 = sshll.u32 %s1755_s26, 7 }
  0x43   : > { %s2389_s24 = scalar_select %p1956_p0, 1, 0 }
  0x44   : > { %s1967_s16 = sshll.u32 %s2353_s15, 3  ;;  %p1971_p4 = pnand %p2357_p2, %p62_p9 }
  0x45   : > { %2390 = sst [smem:[#allocation27_spill]] %s2389_s24  ;;  %s400_s11 = sand.u32 1, %s1759_s27  }
  0x46   : > { %s2391_s30 = scalar_select %p1971_p4, 1, 0 }
  0x47   : > { %s2392_s1 = sld [smem:[#allocation28_spill]]  ;;  %s404_s20 = scalar_lea.vmem [#allocation8], %s1967_s16 }
  0x48   : > { %s411_s15 = sshll.u32 %s404_s20, 4  ;;  %s1985_s12 = scalar_lea.sflag [#allocation9], %s400_s11  ;;  %s1983_s15 = int_to_ptr.vmem [resolvable:$true] %s411_s15 }
  0x49   : > { %p1991_p6 = pneg %p1971_p4 }
  0x4b   : > { %s2393_s5 = scalar_select %p1991_p6, 1, 0 }
  0x4d   : > { %s1980_s24 = scalar_lea.hbm %s2392_s1, %s1963_s14  ;;  %s1482_s10 = scalar_lea.hbm %s2392_s1, 256 }
  0x4e   : > { %s1477_s7 = scalar_lea.hbm %s1980_s24, 128  ;;  %p1483_p10 = scmp.lt.u32.totalorder %s1980_s24, %s2392_s1 }
  0x4f   : > { %p1478_p1 = scmp.ne.s32.totalorder %s1980_s24, %s1477_s7  ;;  %p1484_p11 = scmp.lt.u32.totalorder %s1482_s10, %s1477_s7 }
  0x50   : > { %p1486_p3 = scmp.lt.u32.totalorder %s1477_s7, %s1980_s24 }
  0x51   : > { %p1480_p8 = pnand %p1991_p6, %p1478_p1  ;;  %p1485_p2 = por %p1484_p11, %p1483_p10 }
  0x53   : > { %p1481_p9 = pneg %p1480_p8  ;;  %p1487_p7 = por %p1486_p3, %p1485_p2 }
  0x55   : > { %p1488_p0 = pnand %p1487_p7, %p1481_p9 }
  0x57   : > { %1491 = shalt.err (!%p1488_p0)
}
  0x58   : > { %s1492_s11 = scalar_lea.vmem %s1983_s15, 128  ;;  %s1764_s3 = smov [#allocation8]  }
  0x59   : > { %p1493_p1 = scmp.ne.s32.totalorder %s1983_s15, %s1492_s11  ;;  %s1497_s9 = sshll.u32 %s1764_s3, 4  ;;  %s1498_s9 = int_to_ptr.vmem [resolvable:$false] %s1497_s9 }
  0x5a   : > { %s1499_s23 = scalar_lea.vmem %s1498_s9, 256  ;;  %p1500_p12 = scmp.lt.s32.totalorder %s1983_s15, %s1498_s9 }
  0x5b   : > { %p1495_p8 = pnand %p1493_p1, %p1991_p6  ;;  %p1501_p5 = scmp.lt.s32.totalorder %s1499_s23, %s1492_s11 }
  0x5d   : > { %p1496_p13 = pneg %p1495_p8  ;;  %p1502_p10 = por %p1501_p5, %p1500_p12 }
  0x5f   : > { %p1503_p11 = pnand %p1502_p10, %p1496_p13 }
  0x61   : > { %1506 = shalt.err (!%p1503_p11)
}
  0x62   : > { %1323 = dma.hbm_to_vmem [thread:$0]  (!%p1971_p4), %s1980_s24, 128, %s1983_s15, %s1985_s12  }
  0x63   : > { %s1765_s7 = smov [#allocation13]   ;;  %s1507_s3 = scalar_lea.hbm %s2338_s4, 256 }
  0x64   : > { %s353_s10 = sshll.u32 %s1765_s7, 4  ;;  %p1508_p5 = scmp.ne.s32.totalorder %s2338_s4, %s1507_s3  ;;  %s354_s10 = int_to_ptr.vmem [resolvable:$true] %s353_s10 }
  0x65   : > { %p2394_p7 = scmp.ne.s32.totalorder %s2382_s13, 0  ;;  %p1514_p0 = scmp.lt.u32.totalorder %s1507_s3, %s2338_s4 }
  0x67   : > { %p2395_p3 = pneg %p2394_p7 }
  0x69   : > { %p1510_p12 = pnand %p1508_p5, %p2395_p3 }
  0x6b   : > { %p1511_p13 = pneg %p1510_p12 }
  0x6d   : > { %p1516_p2 = pnand %p1514_p0, %p1511_p13 }
  0x6f   : > { %1519 = shalt.err (!%p1516_p2)
}
  0x70   : > { %s1520_s24 = scalar_lea.vmem %s354_s10, 256  ;;  %p2396_p1 = pmov %p2395_p3 }
  0x71   : > { %p1521_p9 = scmp.ne.s32.totalorder %s354_s10, %s1520_s24  ;;  %p1528_p11 = scmp.lt.s32.totalorder %s354_s10, %s354_s10 }
  0x72   : > { %p1529_p4 = scmp.lt.s32.totalorder %s1520_s24, %s1520_s24 }
  0x73   : > { %p1523_p8 = pnand %p1521_p9, %p2396_p1 }
  0x74   : > { %p1530_p6 = por %p1529_p4, %p1528_p11 }
  0x75   : > { %p1524_p10 = pneg %p1523_p8 }
  0x77   : > { %p1531_p3 = pnand %p1530_p6, %p1524_p10 }
  0x79   : > { %1534 = shalt.err (!%p1531_p3)
}
  0x7a   : > { %s2397_s1 = smov 4   ;;  %s2398_s8 = smov 64  }
  0x7b   : > { %1316 = dma.hbm_to_vmem [thread:$0]  (!%p2394_p7), %s2338_s4, 256, %s354_s10, [#allocation12], %s2398_s8, %s2398_s8, %s2397_s1  }
  0x7c   : > { %s2042_s9 = scalar_lea.hbm %s2334_s0, %s1963_s14  ;;  %s386_s13 = scalar_lea.vmem [#allocation5], %s1967_s16 }
  0x7d   : > { %s393_s11 = sshll.u32 %s386_s13, 4  ;;  %s2399_s23 = sand.u32 1, %s1739_s22   ;;  %s394_s11 = int_to_ptr.vmem [resolvable:$true] %s393_s11 }
  0x7e   : > { %s383_s24 = scalar_lea.sflag [#allocation6], %s2399_s23  ;;  %s1535_s15 = scalar_lea.hbm %s2042_s9, 128 }
  0x7f   : > { %p1536_p4 = scmp.ne.s32.totalorder %s2042_s9, %s1535_s15  ;;  %p2400_p6 = scmp.ne.s32.totalorder %s2393_s5, 0 }
  0x80   : > { %s1540_s8 = scalar_lea.hbm %s2334_s0, 256  ;;  %p1541_p7 = scmp.lt.u32.totalorder %s2042_s9, %s2334_s0 }
  0x81   : > { %p1538_p5 = pnand %p1536_p4, %p2400_p6  ;;  %p1542_p13 = scmp.lt.u32.totalorder %s1540_s8, %s1535_s15 }
  0x82   : > { %p1544_p2 = scmp.lt.u32.totalorder %s1535_s15, %s2042_s9 }
  0x83   : > { %p1539_p12 = pneg %p1538_p5  ;;  %p1543_p0 = por %p1542_p13, %p1541_p7 }
  0x85   : > { %p1545_p9 = por %p1544_p2, %p1543_p0 }
  0x87   : > { %p1546_p1 = pnand %p1545_p9, %p1539_p12 }
  0x89   : > { %1549 = shalt.err (!%p1546_p1)
}
  0x8a   : > { %s1550_s3 = scalar_lea.vmem %s394_s11, 128  ;;  %s1766_s13 = smov [#allocation5]  }
  0x8b   : > { %p1551_p8 = scmp.ne.s32.totalorder %s394_s11, %s1550_s3  ;;  %s1555_s23 = sshll.u32 %s1766_s13, 4  ;;  %s1556_s23 = int_to_ptr.vmem [resolvable:$false] %s1555_s23 }
  0x8c   : > { %s1557_s10 = scalar_lea.vmem %s1556_s23, 256  ;;  %p1558_p3 = scmp.lt.s32.totalorder %s394_s11, %s1556_s23 }
  0x8d   : > { %p1553_p10 = pnand %p1551_p8, %p2400_p6  ;;  %p1559_p4 = scmp.lt.s32.totalorder %s1557_s10, %s1550_s3 }
  0x8f   : > { %p1554_p11 = pneg %p1553_p10  ;;  %p1560_p5 = por %p1559_p4, %p1558_p3 }
  0x91   : > { %p1561_p7 = pnand %p1560_p5, %p1554_p11 }
  0x93   : > { %1564 = shalt.err (!%p1561_p7)
}
  0x94   : > { %p2401_p13 = scmp.ne.s32.totalorder %s2391_s30, 0  ;;  %s2068_s8 = scalar_lea.hbm %s2336_s2, %s1963_s14 }
  0x95   : > { %s422_s7 = scalar_lea.vmem [#allocation10], %s1967_s16  ;;  %s1565_s3 = scalar_lea.hbm %s2068_s8, 128 }
  0x96   : > { %1320 = dma.hbm_to_vmem [thread:$0]  (!%p2401_p13), %s2042_s9, 128, %s394_s11, %s383_s24  }
  0x97   : > { %s429_s20 = sshll.u32 %s422_s7, 4  ;;  %p1566_p12 = scmp.ne.s32.totalorder %s2068_s8, %s1565_s3  ;;  %s430_s20 = int_to_ptr.vmem [resolvable:$true] %s429_s20 }
  0x98   : > { %s1570_s9 = scalar_lea.hbm %s2336_s2, 256  ;;  %p1571_p9 = scmp.lt.u32.totalorder %s2068_s8, %s2336_s2 }
  0x99   : > { %p1568_p0 = pnand %p1566_p12, %p2400_p6  ;;  %p1572_p1 = scmp.lt.u32.totalorder %s1570_s9, %s1565_s3 }
  0x9a   : > { %p1574_p10 = scmp.lt.u32.totalorder %s1565_s3, %s2068_s8 }
  0x9b   : > { %p1569_p2 = pneg %p1568_p0  ;;  %p1573_p8 = por %p1572_p1, %p1571_p9 }
  0x9d   : > { %p1575_p11 = por %p1574_p10, %p1573_p8 }
  0x9f   : > { %p1576_p3 = pnand %p1575_p11, %p1569_p2 }
  0xa1   : > { %1579 = shalt.err (!%p1576_p3)
}
  0xa2   : > { %s1580_s14 = scalar_lea.vmem %s430_s20, 128  ;;  %s1767_s16 = smov [#allocation10]  }
  0xa3   : > { %p1581_p4 = scmp.ne.s32.totalorder %s430_s20, %s1580_s14  ;;  %s1585_s10 = sshll.u32 %s1767_s16, 4  ;;  %s1586_s10 = int_to_ptr.vmem [resolvable:$false] %s1585_s10 }
  0xa4   : > { %s1587_s15 = scalar_lea.vmem %s1586_s10, 256  ;;  %p1588_p12 = scmp.lt.s32.totalorder %s430_s20, %s1586_s10 }
  0xa5   : > { %p1583_p5 = pnand %p1581_p4, %p2400_p6  ;;  %p1589_p0 = scmp.lt.s32.totalorder %s1587_s15, %s1580_s14 }
  0xa7   : > { %p1584_p7 = pneg %p1583_p5  ;;  %p1590_p13 = por %p1589_p0, %p1588_p12 }
  0xa9   : > { %p1591_p1 = pnand %p1590_p13, %p1584_p7 }
  0xab   : > { %1594 = shalt.err (!%p1591_p1)
}
  0xac   : > { %p2402_p9 = scmp.ne.s32.totalorder %s2391_s30, 0  ;;  %s43_s5 = sadd.s32 1, %s1751_s25 }
  0xad   : > { %p44_p6 = scmp.ge.s32.totalorder %s43_s5, 4  ;;  %s194_s30 = sadd.s32 1, %s1727_s19 }
  0xae   : > { %1326 = dma.hbm_to_vmem [thread:$0]  (!%p2402_p9), %s2068_s8, 128, %s430_s20, %s1985_s12  }
  0xaf   : > { %p201_p13 = scmp.ne.s32.totalorder %s1727_s19, %s1723_s18  ;;  %p207_p2 = scmp.ne.s32.totalorder %s1723_s18, %s1719_s17 }
  0xb0   : > { %s2443_s5 = smov (%p44_p6, %s43_s5), 0  ;;  %s2403_s1 = sadd.s32 1, %s1755_s26 }
  0xb1   : > { %s2445_s1 = smov (!%p44_p6, %s2403_s1), %s1755_s26  ;;  %s191_s7 = ssub.s32 %s1751_s25, %s2443_s5 }
  0xb2   : > { %p2404_p8 = scmp.eq.s32.totalorder %s1759_s27, 0  ;;  %p48_p11 = scmp.ge.s32.totalorder %s2445_s1, 2 }
  0xb3   : > { %p192_p3 = scmp.eq.s32.totalorder %s191_s7, 0  ;;  %p2406_p4 = scmp.eq.s32.totalorder %s1893_s28, 0 }
  0xb4   : > { %p2104_p10 = por %p201_p13, %p2404_p8  ;;  %s436_s17 = sand.u32 1, %s1727_s19  }
  0xb5   : > { %p2110_p5 = por %p207_p2, %p2406_p4  ;;  %s2447_s1 = smov (%p48_p11, %s2445_s1), 0 }
  0xb6   : > { %s2118_s8 = scalar_select %p192_p3, %s1727_s19, %s194_s30  }
  0xb7   : > { %s50_s20 = ssub.s32 %s1755_s26, %s2447_s1  ;;  %s1195_s13 = sshll.u32 %s436_s17, 2 }
  0xb8   : > { %p51_p7 = scmp.eq.s32.totalorder %s50_s20, 0  ;;  %s1196_s23 = sshll.u32 %s1751_s25, 6 }
  0xb9   : > { %s2408_s9 = sadd.s32 1, %s1739_s22  ;;  %s2131_s16 = scalar_lea.hbm %s2340_s6, %s1196_s23 }
  0xba   : > { %s2126_s11 = scalar_select %p51_p7, %s1739_s22, %s2408_s9  }
  0xbb   : > { %s440_s10 = scalar_lea.vmem [#allocation14], %s1195_s13  ;;  %p2409_p12 = scmp.lt.s32.totalorder %s1759_s27, 8 }
  0xbc   : > { %s447_s15 = sshll.u32 %s440_s10, 4  ;;  %s437_s7 = scalar_lea.sflag [#allocation15], %s436_s17  ;;  %s2133_s15 = int_to_ptr.vmem [resolvable:$true] %s447_s15 }
  0xbd   : > { %p2139_p0 = pnand %p2409_p12, %p2104_p10  ;;  %s1595_s20 = scalar_lea.hbm %s2131_s16, 64 }
  0xbe   : > { %p1596_p1 = scmp.ne.s32.totalorder %s2131_s16, %s1595_s20  ;;  %s1600_s3 = scalar_lea.hbm %s2340_s6, 256 }
  0xbf   : > { %p1597_p9 = pneg %p2139_p0  ;;  %p1601_p2 = scmp.lt.u32.totalorder %s2131_s16, %s2340_s6 }
  0xc0   : > { %p1602_p8 = scmp.lt.u32.totalorder %s1600_s3, %s1595_s20  ;;  %p1604_p11 = scmp.lt.u32.totalorder %s1595_s20, %s2131_s16 }
  0xc1   : > { %p1598_p6 = pnand %p1597_p9, %p1596_p1 }
  0xc2   : > { %p1603_p10 = por %p1602_p8, %p1601_p2 }
  0xc3   : > { %p1599_p13 = pneg %p1598_p6 }
  0xc4   : > { %p1605_p3 = por %p1604_p11, %p1603_p10 }
  0xc6   : > { %p1606_p4 = pnand %p1605_p3, %p1599_p13 }
  0xc8   : > { %1609 = shalt.err (!%p1606_p4)
}
  0xc9   : > { %s1610_s17 = scalar_lea.vmem %s2133_s15, 64  ;;  %s1768_s14 = smov [#allocation14]  }
  0xca   : > { %p1611_p7 = scmp.ne.s32.totalorder %s2133_s15, %s1610_s17  ;;  %s1615_s10 = sshll.u32 %s1768_s14, 4  ;;  %s1616_s10 = int_to_ptr.vmem [resolvable:$false] %s1615_s10 }
  0xcb   : > { %s1617_s13 = scalar_lea.vmem %s1616_s10, 128  ;;  %p1618_p6 = scmp.lt.s32.totalorder %s2133_s15, %s1616_s10 }
  0xcc   : > { %p1613_p12 = pnand %p1611_p7, %p1597_p9  ;;  %p1619_p2 = scmp.lt.s32.totalorder %s1617_s13, %s1610_s17 }
  0xce   : > { %p1614_p1 = pneg %p1613_p12  ;;  %p1620_p8 = por %p1619_p2, %p1618_p6 }
  0xd0   : > { %p1621_p10 = pnand %p1620_p8, %p1614_p1 }
  0xd2   : > { %1624 = shalt.err (!%p1621_p10)
}
  0xd3   : > { %1329 = dma.hbm_to_vmem [thread:$0]  (!%p2139_p0), %s2131_s16, 64, %s2133_s15, %s437_s7  }
  0xd4   : > { %p2411_p13 = scmp.ne.s32.totalorder %s2381_s29, 0 }
  0xd5   : > { %s2412_s20 = sld [smem:[#allocation25_spill]] (!%p2411_p13)  ;;  %s2171_s23 = sand.u32 (!%p2411_p13), 1, %s1735_s21  }
  0xd6   : > { %456 = sbr.rel (%p2411_p13) target bundleno = 1583 (0x62f), region = 64  ;;  %s2174_s3 = sshll.u32 (!%p2411_p13), %s2171_s23, 3 }
  0xd7   : > { %s459_s9 = scalar_lea.sflag (!%p2411_p13), [#allocation6], %s2171_s23  ;;  %s462_s24 = scalar_lea.vmem (!%p2411_p13), [#allocation5], %s2174_s3 }
  0xdb   : > { %p2413_p9 = scmp.ne.s32.totalorder (!%p2411_p13), %s2412_s20, 0 }
  0xdd   : > { %1698 = dma.done.wait (%p2413_p9), %s459_s9, 128  }
  0xde   : > { %1700 = vsyncadd (%p2413_p9), %s459_s9, 4294967168  ;;  %s467_s29 = sand.u32 1, %s1893_s28   ;;  %s471_s15 = scalar_lea.vmem [#allocation8], %s2174_s3 }
  0xdf   : > { %s468_s16 = scalar_lea.sflag [#allocation9], %s467_s29 }
  0xe0   : > { %1702 = dma.done.wait (%p2413_p9), %s468_s16, 256  }
  0xe1   : > { %1704 = vsyncadd (%p2413_p9), %s468_s16, 4294967040  ;;  %s480_s30 = scalar_lea.vmem [#allocation10], %s2174_s3  ;;  %p2414_p0 = scmp.eq.s32.totalorder %s1893_s28, 0 }
  0xe3   : > { %1706 = dma.done.wait (%p2414_p0), [#allocation12], 512   ;;  %p2415_p11 = pmov %p2414_p0 }
  0xe4   : > { %s493_s7 = sand.u32 1, %s1723_s18  }
  0xe5   : > { %1708 = vsyncadd (%p2415_p11), [#allocation12], 4294966784  ;;  %s2194_s17 = sshll.u32 %s493_s7, 2  ;;  %s494_s14 = scalar_lea.sflag [#allocation15], %s493_s7 }
  0xe6   : > { %s497_s10 = scalar_lea.vmem [#allocation14], %s2194_s17 }
  0xe7   : > { %1710 = dma.done.wait (%p2110_p5), %s494_s14, 64  }
  0xe8   : > { %1712 = vsyncadd (%p2110_p5), %s494_s14, 4294967232  ;;  %s2202_s13 = scalar_lea.vmem [#allocation16], %s2174_s3  ;;  %s2416_s20 = sld [smem:[#allocation23_spill]] }
  0xee   : > { %p1205_p3 = scmp.ne.s32.totalorder %s2416_s20, 0 }
  0xef   : > { %v1439_v0 = vld [vmem:[#allocation11] sm:$0xff] (!%p1205_p3)   ;;  %v1769_v1 = vmov (!%p1205_p3), 0.0   ;;  %v1440_v2 = vld [vmem:[#allocation11 + $0x8] sm:$0xff] (!%p1205_p3)   ;;  %v1441_v3 = vld [vmem:[#allocation13] sm:$0xff] (!%p1205_p3)   ;;  %vm1770_vm0 = vmmov (!%p1205_p3), 0   ;;  %vm581_vm1 = vcmask (!%p1205_p3), 261120  }
  0xf0   : > { %555 = sbr.rel (%p1205_p3) target bundleno = 596 (0x254), region = 92  ;;  %1250 = vmatprep.subr.bf16.mxu0 (!%p1205_p3), %v1769_v1  ;;  %1258 = vmatprep.subr.bf16.mxu1 (!%p1205_p3), %v1769_v1  ;;  %v556_v4 = vld [vmem:[%s462_s24] sm:$0xff] (!%p1205_p3)  ;;  %s2417_s9 = sld [smem:[#allocation34_spill]] (!%p1205_p3)  ;;  %v646_v8 = vld [vmem:[%s471_s15] sm:$0xff] (!%p1205_p3)  ;;  %vm626_vm2 = vcmask (!%p1205_p3), 60416  }
  0xf1   : > { %1251 = vmatpush3.bf16.msra.mxu0 (!%p1205_p3), %v1439_v0  ;;  %1254 = vmatprep.mubr.msk.bf16.mxu0 (!%p1205_p3), %vm1770_vm0, %v1769_v1  ;;  %v1442_v6 = vld [vmem:[#allocation13 + $0x8] sm:$0xff] (!%p1205_p3)   ;;  %v557_v7 = vpack.c.bf16 (!%p1205_p3), %v556_v4, %v556_v4  ;;  %s2418_s24 = sld [smem:[#allocation30_spill]] (!%p1205_p3)  ;;  %v647_v10 = vpack.c.bf16 (!%p1205_p3), %v646_v8, %v646_v8  ;;  %s2420_s12 = sld [smem:[#allocation31_spill]] (!%p1205_p3) }
  0xf2   : > { %1252 = vmatprep.subr.bf16.mxu0 (!%p1205_p3), %v1769_v1  ;;  %1262 = vmatprep.mubr.msk.bf16.mxu1 (!%p1205_p3), %vm1770_vm0, %v1769_v1  ;;  %v734_v12 = vld [vmem:[%s480_s30] sm:$0xff] (!%p1205_p3)  ;;  %s2421_s16 = sld [smem:[#allocation32_spill]] (!%p1205_p3)  ;;  %s1771_s3 = smov (!%p1205_p3), 104  }
  0xf3   : > { %1259 = vmatpush3.bf16.msra.mxu1 (!%p1205_p3), %v1441_v3  ;;  %v735_v13 = vpack.c.bf16 (!%p1205_p3), %v734_v12, %v734_v12  ;;  %s1772_s30 = smov (!%p1205_p3), 120   ;;  %s2422_s20 = sld [smem:[#allocation33_spill]] (!%p1205_p3) }
  0xf4   : > { %1260 = vmatprep.subr.bf16.mxu1 (!%p1205_p3), %v1769_v1  ;;  %s1773_s15 = smov (!%p1205_p3), 112  }
  0xf5   : > { %1253 = vmatpush3.bf16.msra.mxu0 (!%p1205_p3), %v1440_v2 }
  0xf6   : > { %v1221_v5 = vld [vmem:[%s2417_s9] ss:$0 sm:$0xff] (!%p1205_p3)  ;;  %1266 = vmatprep.subr.bf16.mxu0 (!%p1205_p3), %v1769_v1 }
  0xf7   : > { %829 = vst.msk [vmem:[%s2202_s13] sm:$0xff] %vm581_vm1, %v1221_v5  ;;  %s2419_s7 = smov %s2418_s24  ;;  %v1443_v9 = vld [vmem:[%s2418_s24] sm:$0xff]   ;;  %1261 = vmatpush3.bf16.msra.mxu1 %v1442_v6 }
  0xf8   : > { %1255 = vmatmul.mubr.msk.bf16.vlgmr.msra.gmra.mrb[0].mxu0 %vm581_vm1, %v557_v7  ;;  %v1444_v11 = vld [vmem:[%s2419_s7 + $0x8] sm:$0xff]   ;;  %v1206_v14 = vld [vmem:[%s2420_s12] ss:$0 sm:$0xff] }
  0xf9   : > { %1267 = vmatpush3.bf16.msra.mxu0 %v1443_v9  ;;  %1270 = vmatprep.mubr.msk.bf16.mxu0 %vm1770_vm0, %v1769_v1  ;;  %v1211_v16 = vld [vmem:[%s2421_s16] ss:$0 sm:$0xff] }
  0xfa   : > { %1263 = vmatmul.mubr.msk.bf16.vlgmr.msra.gmra.mrb[0].mxu1 %vm581_vm1, %v647_v10  ;;  %1268 = vmatprep.subr.bf16.mxu0 %v1769_v1  ;;  %v1216_v28 = vld [vmem:[%s2422_s20] ss:$0 sm:$0xff] }
  0xfd   : > { %1269 = vmatpush3.bf16.msra.mxu0 %v1444_v11 }
 0x100   : > { %1271 = vmatmul.mubr.msk.bf16.vlgmr.msra.gmra.mrb[4].mxu0 %vm581_vm1, %v735_v13 }
 0x1cb   : > { %v619_v15 = vpop.f32.mrb[0].mxu0 }
 0x1cc   : > { %v620_v17 = vadd.f32 %v1206_v14, %v619_v15  ;;  %v1256_v18 = vpop.f32.mrb[1].mxu0 }
 0x1cd   : > { %v622_v19 = vpop.f32.mrb[2].mxu0  ;;  %v708_v20 = vpop.f32.mrb[0].mxu1 }
 0x1ce   : > { %v625_v21 = vpack.c.bf16 %v620_v17, %v620_v17  ;;  %v1257_v22 = vpop.f32.mrb[3].mxu0  ;;  %v709_v23 = vadd.f32 %v1211_v16, %v708_v20  ;;  %v1264_v24 = vpop.f32.mrb[1].mxu1 }
 0x1cf   : > { %v711_v25 = vpop.f32.mrb[2].mxu1 }
 0x1d0   : > { %627 = vst.msk [vmem:[#allocation2] sm:$0xf] %vm626_vm2, %v625_v21  ;;  %v714_v26 = vpack.c.bf16 %v709_v23, %v709_v23  ;;  %641 = vrot.lane.b32.xlu1 %v625_v21, %s1771_s3  ;;  %631 = vrot.lane.b32.xlu0 %v625_v21, %s1772_s30  ;;  %v1265_v27 = vpop.f32.mrb[3].mxu1 }
 0x1d2   : > { %715 = vst.msk [vmem:[#allocation3] sm:$0xf] %vm626_vm2, %v714_v26 }
 0x1d3   : > { %v796_v29 = vpop.f32.mrb[4].mxu0 }
 0x1d4   : > { %719 = vrot.lane.b32.xlu1 %v714_v26, %s1772_s30  ;;  %636 = vrot.lane.b32.xlu0 %v625_v21, %s1773_s15  ;;  %v797_v30 = vadd.f32 %v1216_v28, %v796_v29  ;;  %v1272_v31 = vpop.f32.mrb[5].mxu0 }
 0x1d5   : > { %v799_v32 = vpop.f32.mrb[6].mxu0 }
 0x1d6   : > { %v802_v33 = vpack.c.bf16 %v797_v30, %v797_v30  ;;  %v1273_v34 = vpop.f32.mrb[7].mxu0 }
 0x1d8   : > { %803 = vst.msk [vmem:[#allocation4] sm:$0xf] %vm626_vm2, %v802_v33  ;;  %729 = vrot.lane.b32.xlu1 %v714_v26, %s1771_s3  ;;  %724 = vrot.lane.b32.xlu0 %v714_v26, %s1773_s15 }
 0x1dc   : > { %812 = vrot.lane.b32.xlu1 %v802_v33, %s1773_s15  ;;  %807 = vrot.lane.b32.xlu0 %v802_v33, %s1772_s30 }
 0x1e0   : > { %817 = vrot.lane.b32.xlu0 %v802_v33, %s1771_s3 }
 0x242   : > { %v642_v35 = vpop.permute.xlu1 %641  ;;  %v632_v36 = vpop.permute.xlu0 %631 }
 0x243   : > { %645 = vst.msk [vmem:[#allocation2 + $0xc] sm:$0xf] %vm626_vm2, %v642_v35  ;;  %635 = vst.msk [vmem:[#allocation2 + $0x4] sm:$0xf] %vm626_vm2, %v632_v36 }
 0x246   : > { %v720_v37 = vpop.permute.xlu1 %719  ;;  %v637_v38 = vpop.permute.xlu0 %636 }
 0x247   : > { %723 = vst.msk [vmem:[#allocation3 + $0x4] sm:$0xf] %vm626_vm2, %v720_v37  ;;  %640 = vst.msk [vmem:[#allocation2 + $0x8] sm:$0xf] %vm626_vm2, %v637_v38 }
 0x24a   : > { %v730_v39 = vpop.permute.xlu1 %729  ;;  %v725_v40 = vpop.permute.xlu0 %724 }
 0x24b   : > { %733 = vst.msk [vmem:[#allocation3 + $0xc] sm:$0xf] %vm626_vm2, %v730_v39  ;;  %728 = vst.msk [vmem:[#allocation3 + $0x8] sm:$0xf] %vm626_vm2, %v725_v40 }
 0x24e   : > { %v813_v41 = vpop.permute.xlu1 %812  ;;  %v808_v42 = vpop.permute.xlu0 %807 }
 0x24f   : > { %816 = vst.msk [vmem:[#allocation4 + $0x8] sm:$0xf] %vm626_vm2, %v813_v41  ;;  %811 = vst.msk [vmem:[#allocation4 + $0x4] sm:$0xf] %vm626_vm2, %v808_v42 }
 0x252   : > { %v818_v43 = vpop.permute.xlu0 %817 }
 0x253   : > { %821 = vst.msk [vmem:[#allocation4 + $0xc] sm:$0xf] %vm626_vm2, %v818_v43 }
 0x254 PF: > { %s2423_s28 = sld [smem:[#allocation23_spill]]  ;;  %vm839_vm3 = vcmask 64512   ;;  %v1774_v44 = vmov 0.0   ;;  %vm1775_vm4 = vmmov 0   ;;  %vm901_vm5 = vcmask 1043456   ;;  %s2424_s3 = sld [smem:[#allocation24_spill]] }
 0x255   : > { %1274 = vmatprep.subr.bf16.mxu0 %v1774_v44  ;;  %1276 = vmatprep.mubr.msk.bf16.mxu0 %vm1775_vm4, %v1774_v44  ;;  %v947_v62 = vld [vmem:[%s497_s10] sm:$0xf]  ;;  %s2425_s17 = sld [smem:[#allocation26_spill]]  ;;  %s1011_s30 = sshll.u32 %s2202_s13, 4  ;;  %vm995_vm6 = vcmask 261120   ;;  %s2272_s30 = int_to_ptr.vmem [resolvable:$true] %s1011_s30 }
 0x256   : > { %1280 = vmatprep.subr.bf16.mxu1 %v1774_v44  ;;  %1282 = vmatprep.mubr.msk.bf16.mxu1 %vm1775_vm4, %v1774_v44  ;;  %v952_v0 = vsel %vm901_vm5, %v947_v62, 0  ;;  %s2426_s20 = sld [smem:[#allocation35_spill]] }
 0x25a   : > { %s2248_s12 = sshll.u32 %s2423_s28, 2  ;;  %s1229_s10 = sshll.u32 %s2424_s3, 7 }
 0x25b   : > { %s834_s9 = scalar_lea.vmem [#allocation3], %s2248_s12  ;;  %s831_s29 = scalar_lea.vmem [#allocation2], %s2248_s12  ;;  %v945_v7 = vld [vmem:[%s2202_s13] sm:$0xff] }
 0x25c   : > { %v835_v45 = vld [vmem:[%s834_s9] sm:$0xf]  ;;  %s837_s16 = scalar_lea.vmem [#allocation4], %s2248_s12  ;;  %s2427_s15 = smov %s2426_s20 }
 0x25d   : > { %v844_v46 = vsel %vm839_vm3, %v835_v45, 0  ;;  %v832_v47 = vld [vmem:[%s831_s29] sm:$0xf]  ;;  %s2270_s28 = scalar_lea.hbm %s2426_s20, %s1229_s10  ;;  %s998_s12 = scalar_lea.sflag [#allocation7], %s2171_s23 }
 0x25e   : > { %1275 = vmatpush3.bf16.xpose.msra.mxu0 %v844_v46  ;;  %v838_v58 = vld [vmem:[%s837_s16] sm:$0xf]  ;;  %s1625_s9 = scalar_lea.vmem %s2272_s30, 128  ;;  %p2428_p4 = scmp.ne.s32.totalorder %s2425_s17, 0 }
 0x25f   : > { %v903_v59 = vsel %vm901_vm5, %v838_v58, 0  ;;  %p1626_p5 = scmp.ne.s32.totalorder %s2272_s30, %s1625_s9  ;;  %s1776_s29 = smov [#allocation16]  }
 0x260   : > { %1281 = vmatpush3.bf16.msra.mxu1 %v903_v59  ;;  %s1629_s16 = sshll.u32 %s1776_s29, 4  ;;  %s1630_s16 = int_to_ptr.vmem [resolvable:$false] %s1629_s16 }
 0x261   : > { %1286 = vmatprep.subr.bf16.mxu1 %v1774_v44  ;;  %p1627_p7 = pnand %p1626_p5, %p2428_p4  ;;  %s1631_s3 = scalar_lea.vmem %s1630_s16, 256 }
 0x262   : > { %p1632_p1 = scmp.lt.s32.totalorder %s2272_s30, %s1630_s16  ;;  %p1633_p6 = scmp.lt.s32.totalorder %s1631_s3, %s1625_s9 }
 0x263   : > { %p1628_p12 = pneg %p1627_p7 }
 0x264   : > { %p1634_p2 = por %p1633_p6, %p1632_p1 }
 0x265   : > { %1277 = vmatmul.mubr.msk.bf16.vlgmr.msra.gmra.mrb[0].mxu0 %vm839_vm3, %v832_v47 }
 0x266   : > { %p1635_p8 = pnand %p1634_p2, %p1628_p12 }
 0x338   : > { %v880_v48 = vpop.f32.mrb[0].mxu0 }
 0x339   : > { %v1278_v49 = vpop.f32.mrb[1].mxu0  ;;  %v886_v50 = vsel %vm839_vm3, %v880_v48, -inf }
 0x33a   : > { %887 = vmax.xlane.f32.xlu0 %v886_v50  ;;  %v883_v51 = vpop.f32.mrb[2].mxu0 }
 0x33b   : > { %v1279_v52 = vpop.f32.mrb[3].mxu0 }
 0x3c7   : > { %v888_v53 = vpop.xlane.xlu0 %887 }
 0x3c8   : > { %v889_v54 = vsub.f32 %v880_v48, %v888_v53 }
 0x3ca   : > { %v890_v55 = vmul.f32 1.442695, %v889_v54 }
 0x3cc   : > { %1445 = vpow2.f32 %v890_v55 }
 0x3d6   : > { %v1446_v56 = vpop.eup %1445 }
 0x3d7   : > { %v892_v57 = vsel %vm839_vm3, %v1446_v56, 0.0 }
 0x3d8   : > { %893 = vadd.xlane.f32.xlu0 %v892_v57 }
 0x465   : > { %v894_v60 = vpop.xlane.xlu0 %893 }
 0x466   : > { %1447 = vrcp.f32 %v894_v60 }
 0x470   : > { %v1448_v61 = vpop.eup %1447 }
 0x471   : > { %v896_v63 = vmul.f32 %v1448_v61, %v1446_v56 }
 0x473   : > { %v897_v1 = vpack.c.bf16 %v896_v63, %v896_v63 }
 0x475   : > { %1283 = vmatmul.mubr.msk.bf16.vlgmr.msra.gmra.mrb[0].mxu1 %vm839_vm3, %v897_v1 }
 0x476   : > { %1287 = vmatpush3.bf16.msra.mxu1 %v952_v0  ;;  %1288 = vmatprep.mubr.msk.bf16.mxu1 %vm1775_vm4, %v1774_v44 }
 0x548   : > { %v939_v2 = vpop.f32.mrb[0].mxu1 }
 0x549   : > { %v946_v3 = vpack.c.bf16 %v939_v2, %v939_v2  ;;  %v1284_v4 = vpop.f32.mrb[1].mxu1 }
 0x54a   : > { %v942_v5 = vpop.f32.mrb[2].mxu1 }
 0x54b   : > { %v1285_v6 = vpop.f32.mrb[3].mxu1  ;;  %1289 = vmatmul.mubr.msk.bf16.vlgmr.msra.gmra.mrb[4].mxu1 %vm839_vm3, %v946_v3 }
 0x61e   : > { %v988_v8 = vpop.f32.mrb[4].mxu1 }
 0x61f   : > { %v994_v9 = vadd.f32 %v988_v8, %v945_v7  ;;  %v1290_v10 = vpop.f32.mrb[5].mxu1 }
 0x620   : > { %v991_v11 = vpop.f32.mrb[6].mxu1 }
 0x621   : > { %v1291_v12 = vpop.f32.mrb[7].mxu1  ;;  %996 = vst.msk [vmem:[%s2202_s13] sm:$0xff] %vm995_vm6, %v994_v9 }
 0x622   : > { %1638 = shalt.err (!%p1635_p8)
}
 0x623   : > { %s1639_s23 = scalar_lea.hbm %s2270_s28, 128  ;;  %s1643_s24 = scalar_lea.hbm %s2427_s15, 256 }
 0x624   : > { %p1640_p10 = scmp.ne.s32.totalorder %s2270_s28, %s1639_s23  ;;  %p1644_p0 = scmp.lt.u32.totalorder %s2270_s28, %s2427_s15 }
 0x625   : > { %p1645_p11 = scmp.lt.u32.totalorder %s1643_s24, %s1639_s23  ;;  %p1647_p5 = scmp.lt.u32.totalorder %s1639_s23, %s2270_s28 }
 0x626   : > { %p1641_p13 = pnand %p1640_p10, %p2428_p4 }
 0x627   : > { %p1646_p3 = por %p1645_p11, %p1644_p0 }
 0x628   : > { %p1642_p9 = pneg %p1641_p13 }
 0x629   : > { %p1648_p7 = por %p1647_p5, %p1646_p3 }
 0x62b   : > { %p1649_p12 = pnand %p1648_p7, %p1642_p9 }
 0x62d   : > { %1652 = shalt.err (!%p1649_p12)
}
 0x62e   : > { %1308 = dma.vmem_to_hbm [thread:$0]  (%p2428_p4), %s2272_s30, 128, %s2270_s28, %s998_s12  }
 0x62f PF: > { %s2429_s9 = sld [smem:[#allocation22_spill]]  ;;  %s2430_s29 = sld [smem:[#allocation27_spill]] }
 0x630   : > { %p1339_p1 = scmp.ge.s32.totalorder %s1759_s27, 2 }
 0x635   : > { %s1023_s16 = sand.u32 1, %s2429_s9   ;;  %p2431_p6 = scmp.ne.s32.totalorder %s2430_s29, 0 }
 0x636   : > { %s1024_s3 = scalar_lea.sflag [#allocation7], %s1023_s16 }
 0x637   : > { %p1331_p2 = pnand %p1339_p1, %p2431_p6 }
 0x639   : > { %1714 = dma.done.wait (!%p1331_p2), %s1024_s3, 128  }
 0x63a   : > { %1716 = vsyncadd (!%p1331_p2), %s1024_s3, 4294967168  ;;  %s34_s27 = sadd.s32 1, %s1759_s27   ;;  %s2432_s17 = smov %s1723_s18 }
 0x63b   : > { %p31_p8 = scmp.ge.s32.totalorder %s34_s27, 10   ;;  %s2433_s18 = smov %s1727_s19 }
 0x63c   : > { %s2434_s19 = smov %s2118_s8  ;;  %s2435_s20 = smov %s1735_s21 }
 0x63d   : > { %s2436_s21 = smov %s1739_s22  ;;  %s2437_s22 = smov %s2126_s11 }
 0x63e   : > { %s2438_s23 = smov %s1751_s25  ;;  %s2439_s24 = smov %s1755_s26 }
 0x63f   : > { %s2440_s25 = smov %s2443_s5  ;;  %s2441_s26 = smov %s2447_s1 }
 0x640   :  { %33 = sbr.rel (!%p31_p8) target bundleno = 23 (0x17), region = 170 }
 0x647   :  { %1029 = vsyncpa [#allocation6], 1 }
 0x648   :  { %1031 = vsyncpa [#allocation6 + $0x1], 1 }
 0x649   :  { %1032 = vsyncpa [#allocation9], 1 }
 0x64a   :  { %1034 = vsyncpa [#allocation9 + $0x1], 1 }
 0x64b   :  { %1035 = vsyncpa [#allocation12], 1 }
 0x64c   :  { %1036 = vsyncpa [#allocation15], 1 }
 0x64d   :  { %1038 = vsyncpa [#allocation15 + $0x1], 1 }
 0x64e   :  { %1039 = vsyncpa [#allocation7], 1 }
 0x64f   :  { %1041 = vsyncpa [#allocation7 + $0x1], 1 }

</bundles_post_ra>
